<compile_context>
chip_gen: v6e
topology: v6e:2x2x1
jax: 0.10.0
libtpu: 0.0.40
codegen_flags: <defaults>
</compile_context>

<pallas_src>
import functools

import jax
import jax.numpy as jnp
from jax.experimental import pallas as pl
from jax.experimental.pallas import tpu as pltpu

BN_EPS = 1e-5
VMEM_LIMIT = 32 * 1024 * 1024


def _ru(x, m):
    return (x + m - 1) // m * m


# ---------------------------------------------------------------------------
# Pallas kernels
# ---------------------------------------------------------------------------
def _gemm_kernel(a_ref, b_ref, t_ref, o_ref, acc_ref, *, relu):
    """Tiled GEMM: bf16 x bf16 -> f32 acc, epilogue: + shift (+ relu)."""
    @pl.when(pl.program_id(2) == 0)
    def _():
        acc_ref[...] = jnp.zeros_like(acc_ref)

    acc_ref[...] += jnp.dot(a_ref[...], b_ref[...],
                            preferred_element_type=jnp.float32)

    @pl.when(pl.program_id(2) == pl.num_programs(2) - 1)
    def _():
        y = acc_ref[...] + t_ref[...]
        if relu:
            y = jnp.maximum(y, 0.0)
        o_ref[...] = y.astype(o_ref.dtype)


def _gemm_res_kernel(a_ref, b_ref, t_ref, r_ref, o_ref, acc_ref, *, relu):
    """Same as _gemm_kernel but fuses the residual add in the epilogue."""
    @pl.when(pl.program_id(2) == 0)
    def _():
        acc_ref[...] = jnp.zeros_like(acc_ref)

    acc_ref[...] += jnp.dot(a_ref[...], b_ref[...],
                            preferred_element_type=jnp.float32)

    @pl.when(pl.program_id(2) == pl.num_programs(2) - 1)
    def _():
        y = acc_ref[...] + t_ref[...] + r_ref[...].astype(jnp.float32)
        if relu:
            y = jnp.maximum(y, 0.0)
        o_ref[...] = y.astype(o_ref.dtype)


def _conv3x3_kernel(x_ref, w_ref, t_ref, o_ref, acc_ref, *, taps_off, out_rows, relu):
    """Direct 3x3 stride-1 conv on a flattened zero-padded NHWC image.

    x_ref : (1, rows_in, Cin)  bf16  -- whole padded image of one batch element
    w_ref : (9, Cin, Cout)     bf16  -- BN-folded weights, one slab per tap
    t_ref : (1, Cout)          f32   -- BN shift
    o_ref : (1, out_rows, Cout)      -- output rows in padded-width coordinates
    """
    acc_ref[...] = jnp.zeros_like(acc_ref)
    for idx, off in enumerate(taps_off):
        acc_ref[...] += jnp.dot(x_ref[0, off:off + out_rows, :], w_ref[idx],
                                preferred_element_type=jnp.float32)
    y = acc_ref[...] + t_ref[...]
    if relu:
        y = jnp.maximum(y, 0.0)
    o_ref[0] = y.astype(o_ref.dtype)


def _maxpool_kernel(x_ref, o_ref, *, taps_off, out_rows):
    """3x3 window max (stride 1) via 9 shifted loads; stride-2 subsample is done
    outside on the (already small) result."""
    o_ref[0] = x_ref[0, taps_off[0]:taps_off[0] + out_rows, :]
    for off in taps_off[1:]:
        o_ref[0] = jnp.maximum(o_ref[0], x_ref[0, off:off + out_rows, :])


def _avgpool_kernel(x_ref, o_ref, *, inv_hw):
    o_ref[...] = jnp.sum(x_ref[...].astype(jnp.float32), axis=1) * inv_hw


# ---------------------------------------------------------------------------
# GEMM wrapper (bf16 operands, tile selection, padding)
# ---------------------------------------------------------------------------
def pallas_gemm(a, b_packed, shift_packed, residual=None, relu=False,
                out_dtype=jnp.bfloat16):
    """act((a @ b_packed) + shift (+ residual)).  Returns (M, Np)."""
    M, K = a.shape
    Kp, Np = b_packed.shape
    assert Kp % 128 == 0 and Np % 128 == 0 and K <= Kp

    if M >= 256:
        TM = 256
    elif M >= 128:
        TM = 128
    else:
        TM = _ru(M, 8)
    Mp = _ru(M, TM)
    TK = max(t for t in (512, 256, 128) if Kp % t == 0)
    if M < 128:
        # tiny-M (FC head / deep layers): stream the weight in wide lane-dense tiles
        TN = max(t for t in (1024, 512, 256, 128) if Np % t == 0)
    else:
        TN = 256 if Np % 256 == 0 else 128

    a_p = a.astype(jnp.bfloat16)
    if (Mp, Kp) != (M, K):
        a_p = jnp.pad(a_p, ((0, Mp - M), (0, Kp - K)))

    grid = (Mp // TM, Np // TN, Kp // TK)
    a_spec = pl.BlockSpec((TM, TK), lambda i, j, k: (i, k))
    b_spec = pl.BlockSpec((TK, TN), lambda i, j, k: (k, j))
    t_spec = pl.BlockSpec((1, TN), lambda i, j, k: (0, j))
    o_spec = pl.BlockSpec((TM, TN), lambda i, j, k: (i, j))

    cparams = pltpu.CompilerParams(
        dimension_semantics=("parallel", "parallel", "arbitrary"),
        vmem_limit_bytes=VMEM_LIMIT)
    scratch = [pltpu.VMEM((TM, TN), jnp.float32)]
    out_shape = jax.ShapeDtypeStruct((Mp, Np), out_dtype)

    if residual is None:
        out = pl.pallas_call(
            functools.partial(_gemm_kernel, relu=relu),
            out_shape=out_shape,
            grid_spec=pltpu.PrefetchScalarGridSpec(
                num_scalar_prefetch=0, grid=grid,
                in_specs=[a_spec, b_spec, t_spec],
                out_specs=o_spec,
                scratch_shapes=scratch),
            compiler_params=cparams,
        )(a_p, b_packed, shift_packed)
    else:
        r_p = residual.astype(jnp.bfloat16)
        rM, rN = r_p.shape
        if (Mp, Np) != (rM, rN):
            r_p = jnp.pad(r_p, ((0, Mp - rM), (0, Np - rN)))
        out = pl.pallas_call(
            functools.partial(_gemm_res_kernel, relu=relu),
            out_shape=out_shape,
            grid_spec=pltpu.PrefetchScalarGridSpec(
                num_scalar_prefetch=0, grid=grid,
                in_specs=[a_spec, b_spec, t_spec, o_spec],
                out_specs=o_spec,
                scratch_shapes=scratch),
            compiler_params=cparams,
        )(a_p, b_packed, shift_packed, r_p)

    if Mp != M:
        out = out[:M]
    return out


# ---------------------------------------------------------------------------
# Conv / pooling building blocks
# ---------------------------------------------------------------------------
def _im2col(x, kh, kw, stride, pad):
    """Used only for the 7x7 stem, the 3 stride-2 3x3 convs and 1x1 convs
    (for 1x1/stride-1 it is a pure reshape, no patch blow-up)."""
    B, H, W, C = x.shape
    if pad > 0:
        x = jnp.pad(x, ((0, 0), (pad, pad), (pad, pad), (0, 0)))
    Hp, Wp = H + 2 * pad, W + 2 * pad
    OH = (Hp - kh) // stride + 1
    OW = (Wp - kw) // stride + 1
    cols = []
    for i in range(kh):
        for j in range(kw):
            cols.append(x[:, i:i + stride * OH:stride, j:j + stride * OW:stride, :])
    if len(cols) == 1:
        patches = cols[0]
    else:
        patches = jnp.concatenate(cols, axis=-1)          # (B, OH, OW, kh*kw*C)
    return patches.reshape(B * OH * OW, kh * kw * C), (B, OH, OW)


def conv_gemm(x, pk, kh, kw, stride, pad, relu, residual=None):
    """Conv2d + folded BN (+ residual) (+ ReLU) via im2col + fused Pallas GEMM."""
    patches, (B, OH, OW) = _im2col(x, kh, kw, stride, pad)
    res = None if residual is None else residual.reshape(B * OH * OW, -1)
    y = pallas_gemm(patches, pk["w"], pk["shift"], residual=res, relu=relu)
    cout = pk["cout"]
    if y.shape[1] != cout:
        y = y[:, :cout]
    return y.reshape(B, OH, OW, cout)


def conv3x3_s1_bn_relu(x, pk):
    """Direct 3x3 / stride-1 / pad-1 conv + folded BN + ReLU (no im2col in HBM)."""
    B, H, W, Cin = x.shape
    Cout = pk["w3"].shape[-1]
    Wp = W + 2
    # Pad H by (1, 2): the extra bottom row keeps the flattened tap windows in-bounds.
    xp = jnp.pad(x, ((0, 0), (1, 2), (1, 1), (0, 0)))
    rows_in = (H + 3) * Wp
    xf = xp.reshape(B, rows_in, Cin)
    out_rows = H * Wp                                     # padded-width output rows
    taps = tuple(ki * Wp + kj for ki in range(3) for kj in range(3))

    y = pl.pallas_call(
        functools.partial(_conv3x3_kernel, taps_off=taps, out_rows=out_rows,
                          relu=True),
        out_shape=jax.ShapeDtypeStruct((B, out_rows, Cout), jnp.bfloat16),
        grid_spec=pltpu.PrefetchScalarGridSpec(
            num_scalar_prefetch=0, grid=(B,),
            in_specs=[pl.BlockSpec((1, rows_in, Cin), lambda b: (b, 0, 0)),
                      pl.BlockSpec((9, Cin, Cout), lambda b: (0, 0, 0)),
                      pl.BlockSpec((1, Cout), lambda b: (0, 0))],
            out_specs=pl.BlockSpec((1, out_rows, Cout), lambda b: (b, 0, 0)),
            scratch_shapes=[pltpu.VMEM((out_rows, Cout), jnp.float32)]),
        compiler_params=pltpu.CompilerParams(
            dimension_semantics=("parallel",), vmem_limit_bytes=VMEM_LIMIT),
    )(xf, pk["w3"], pk["shift"])

    # Drop the 2 garbage columns per row introduced by the padded-width layout.
    return y.reshape(B, H, Wp, Cout)[:, :, :W, :]


def maxpool_3x3_s2_p1(x):
    B, H, W, C = x.shape
    neg = float(jnp.finfo(x.dtype).min)
    Wp = W + 2
    xp = jnp.pad(x, ((0, 0), (1, 2), (1, 1), (0, 0)), constant_values=neg)
    rows_in = (H + 3) * Wp
    xf = xp.reshape(B, rows_in, C)
    out_rows = H * Wp
    taps = tuple(ki * Wp + kj for ki in range(3) for kj in range(3))

    m = pl.pallas_call(
        functools.partial(_maxpool_kernel, taps_off=taps, out_rows=out_rows),
        out_shape=jax.ShapeDtypeStruct((B, out_rows, C), x.dtype),
        grid_spec=pltpu.PrefetchScalarGridSpec(
            num_scalar_prefetch=0, grid=(B,),
            in_specs=[pl.BlockSpec((1, rows_in, C), lambda b: (b, 0, 0))],
            out_specs=pl.BlockSpec((1, out_rows, C), lambda b: (b, 0, 0))),
        compiler_params=pltpu.CompilerParams(
            dimension_semantics=("parallel",), vmem_limit_bytes=VMEM_LIMIT),
    )(xf)

    m = m.reshape(B, H, Wp, C)
    OH = (H - 1) // 2 + 1
    OW = (W - 1) // 2 + 1
    return m[:, 0:2 * OH:2, 0:2 * OW:2, :]


def global_avgpool(x):
    B, H, W, C = x.shape
    assert C % 128 == 0
    TC = 256 if C % 256 == 0 else 128
    xf = x.reshape(B, H * W, C)
    return pl.pallas_call(
        functools.partial(_avgpool_kernel, inv_hw=1.0 / (H * W)),
        out_shape=jax.ShapeDtypeStruct((B, C), jnp.float32),
        grid_spec=pltpu.PrefetchScalarGridSpec(
            num_scalar_prefetch=0, grid=(C // TC,),
            in_specs=[pl.BlockSpec((B, H * W, TC), lambda c: (0, 0, c))],
            out_specs=pl.BlockSpec((B, TC), lambda c: (0, c))),
        compiler_params=pltpu.CompilerParams(
            dimension_semantics=("parallel",), vmem_limit_bytes=VMEM_LIMIT),
    )(xf)


# ---------------------------------------------------------------------------
# Raw parameter init (PyTorch layout) + one-time packing for inference
# ---------------------------------------------------------------------------
class _KeyGen:
    def __init__(self, key):
        self.key = key

    def next(self):
        self.key, k = jax.random.split(self.key)
        return k


def _init_conv(kg, cout, cin, kh, kw):
    fan_in = cin * kh * kw
    return jax.random.normal(kg.next(), (cout, cin, kh, kw), jnp.float32) * jnp.sqrt(2.0 / fan_in)


def _init_bn(kg, c):
    gamma = jax.random.uniform(kg.next(), (c,), jnp.float32, 0.9, 1.1)
    beta = jax.random.normal(kg.next(), (c,), jnp.float32) * 0.05
    mean = jax.random.normal(kg.next(), (c,), jnp.float32) * 0.05
    var = jax.random.uniform(kg.next(), (c,), jnp.float32, 0.8, 1.2)
    return (gamma, beta, mean, var)


def _init_linear(kg, out_f, in_f):
    w = jax.random.normal(kg.next(), (out_f, in_f), jnp.float32) * jnp.sqrt(1.0 / in_f)
    b = jax.random.normal(kg.next(), (out_f,), jnp.float32) * 0.01
    return (w, b)


def make_params(key, output_dim):
    kg = _KeyGen(key)
    p = {}
    p["stem_conv"] = _init_conv(kg, 64, 3, 7, 7)
    p["stem_bn"] = _init_bn(kg, 64)
    cfg = [(64, 3, 1), (128, 4, 2), (256, 6, 2), (512, 3, 2)]  # resnet50
    inplanes = 64
    layers = []
    for planes, n_blocks, stride in cfg:
        layer = []
        for bi in range(n_blocks):
            s = stride if bi == 0 else 1
            blk = {
                "conv1": _init_conv(kg, planes, inplanes, 1, 1),
                "bn1": _init_bn(kg, planes),
                "conv2": _init_conv(kg, planes, planes, 3, 3),
                "bn2": _init_bn(kg, planes),
                "conv3": _init_conv(kg, planes * 4, planes, 1, 1),
                "bn3": _init_bn(kg, planes * 4),
                "stride": s,
            }
            if bi == 0:
                blk["dconv"] = _init_conv(kg, planes * 4, inplanes, 1, 1)
                blk["dbn"] = _init_bn(kg, planes * 4)
            layer.append(blk)
            inplanes = planes * 4
        layers.append(layer)
    p["layers"] = layers
    p["fc1"] = _init_linear(kg, 1024, 2048)
    p["out"] = _init_linear(kg, output_dim, 1024)
    p["mos"] = _init_linear(kg, 1, 1024)
    return p


def _fold_bn(bn):
    gamma, beta, mean, var = bn
    scale = gamma / jnp.sqrt(var + BN_EPS)
    shift = beta - mean * scale
    return scale, shift


def _pack_conv_gemm(w, bn):
    Cout, Cin, KH, KW = w.shape
    scale, shift = _fold_bn(bn)
    wm = jnp.transpose(w, (2, 3, 1, 0)).reshape(KH * KW * Cin, Cout) * scale[None, :]
    K, N = wm.shape
    Kp, Np = _ru(K, 128), _ru(N, 128)
    wm = jnp.pad(wm, ((0, Kp - K), (0, Np - N))).astype(jnp.bfloat16)
    sh = jnp.pad(shift.reshape(1, N), ((0, 0), (0, Np - N))).astype(jnp.float32)
    return {"w": wm, "shift": sh, "cout": Cout}


def _pack_conv3x3_direct(w, bn):
    Cout, Cin, KH, KW = w.shape
    scale, shift = _fold_bn(bn)
    w3 = (jnp.transpose(w, (2, 3, 1, 0)).reshape(KH * KW, Cin, Cout) * scale)
    return {"w3": w3.astype(jnp.bfloat16),
            "shift": shift.reshape(1, Cout).astype(jnp.float32)}


def _pack_linear(w, b):
    N, K = w.shape
    Kp, Np = _ru(K, 128), _ru(N, 128)
    wm = jnp.pad(w.T, ((0, Kp - K), (0, Np - N))).astype(jnp.bfloat16)
    sh = jnp.pad(b.reshape(1, N), ((0, 0), (0, Np - N))).astype(jnp.float32)
    return {"w": wm, "shift": sh, "n": N}


def prepare_params(raw):
    """One-time fold of BN into conv weights + pre-transpose/pad/cast to bf16."""
    pp = {"stem": _pack_conv_gemm(raw["stem_conv"], raw["stem_bn"])}
    layers = []
    for layer in raw["layers"]:
        blks = []
        for blk in layer:
            b = {"stride": blk["stride"],
                 "conv1": _pack_conv_gemm(blk["conv1"], blk["bn1"]),
                 "conv3": _pack_conv_gemm(blk["conv3"], blk["bn3"])}
            if blk["stride"] == 1:
                b["conv2_direct"] = _pack_conv3x3_direct(blk["conv2"], blk["bn2"])
            else:
                b["conv2"] = _pack_conv_gemm(blk["conv2"], blk["bn2"])
            if "dconv" in blk:
                b["dconv"] = _pack_conv_gemm(blk["dconv"], blk["dbn"])
            blks.append(b)
        layers.append(blks)
    pp["layers"] = layers
    pp["fc1"] = _pack_linear(*raw["fc1"])
    w_out, b_out = raw["out"]
    w_mos, b_mos = raw["mos"]
    # Fuse the `out` and `mos` heads into a single GEMM (N = output_dim + 1).
    pp["head"] = _pack_linear(jnp.concatenate([w_out, w_mos], axis=0),
                              jnp.concatenate([b_out, b_mos], axis=0))
    pp["output_dim"] = int(w_out.shape[0])
    return pp


# ---------------------------------------------------------------------------
# Forward pass
# ---------------------------------------------------------------------------
def _bottleneck(x, blk):
    identity = x
    out = conv_gemm(x, blk["conv1"], 1, 1, 1, 0, relu=True)
    if blk["stride"] == 1:
        out = conv3x3_s1_bn_relu(out, blk["conv2_direct"])
    else:
        # TODO(synk): the 3 stride-2 3x3 convs still use im2col; a strided-window
        # direct kernel would remove the remaining patch materialization.
        out = conv_gemm(out, blk["conv2"], 3, 3, blk["stride"], 1, relu=True)
    if "dconv" in blk:
        identity = conv_gemm(x, blk["dconv"], 1, 1, blk["stride"], 0, relu=False)
    # conv3 + bn3 + residual add + final ReLU fused in one Pallas GEMM epilogue.
    out = conv_gemm(out, blk["conv3"], 1, 1, 1, 0, relu=True, residual=identity)
    return out


def encoder_resnet_forward(img_nchw, pp):
    """Returns (out, mos) matching the PyTorch module's forward()."""
    x = jnp.transpose(img_nchw, (0, 2, 3, 1)).astype(jnp.bfloat16)   # NCHW -> NHWC
    x = conv_gemm(x, pp["stem"], 7, 7, 2, 3, relu=True)
    x = maxpool_3x3_s2_p1(x)
    for layer in pp["layers"]:
        for blk in layer:
            x = _bottleneck(x, blk)
    features = global_avgpool(x)                                      # (B, 2048) f32
    h = pallas_gemm(features.astype(jnp.bfloat16), pp["fc1"]["w"],
                    pp["fc1"]["shift"], relu=True)                    # relu(fc1(.))
    head = pallas_gemm(h, pp["head"]["w"], pp["head"]["shift"],
                       relu=False, out_dtype=jnp.float32)             # (B, Np)
    odim = pp["output_dim"]
    out = head[:, :odim]
    mos = head[:, odim:odim + 1]
    return out, mos


if __name__ == "__main__":
    key = jax.random.PRNGKey(0)
    pkey, xkey = jax.random.split(key)

    output_dim = 5
    raw_params = make_params(pkey, output_dim)
    params = prepare_params(raw_params)

    # Small NCHW input consistent with ResNet-50 (3 input channels, /32 spatial).
    img = jax.random.normal(xkey, (2, 3, 64, 64), jnp.float32)

    out, mos = encoder_resnet_forward(img, params)
    out, mos = jax.block_until_ready((out, mos))

    assert out.shape == (2, output_dim), out.shape
    assert mos.shape == (2, 1), mos.shape
    assert bool(jnp.all(jnp.isfinite(out))) and bool(jnp.all(jnp.isfinite(mos)))
    print("KERNEL_OK")
</pallas_src>

<mosaic_0001>
module attributes {stable_mosaic.version = 11 : i64} {
  func.func @_gemm_kernel(%arg0: i32, %arg1: i32, %arg2: i32, %arg3: memref<256x256xbf16, #tpu.memory_space<vmem>>, %arg4: memref<256x128xbf16, #tpu.memory_space<vmem>>, %arg5: memref<1x128xf32, #tpu.memory_space<vmem>>, %arg6: memref<256x128xbf16, #tpu.memory_space<vmem>>, %arg7: memref<256x128xf32, #tpu.memory_space<vmem>>) attributes {dimension_semantics = [#tpu.dimension_semantics<parallel>, #tpu.dimension_semantics<parallel>, #tpu.dimension_semantics<arbitrary>], iteration_bounds = array<i64: 8, 1, 1>, scalar_prefetch = 0 : i64, scratch_operands = 1 : i64, tpu.core_type = #tpu.core_type<tc>, window_params = [{transform_indices = @transform_0, window_bounds = array<i64: 256, 256>}, {transform_indices = @transform_1, window_bounds = array<i64: 256, 128>}, {transform_indices = @transform_2, window_bounds = array<i64: 1, 128>}, {transform_indices = @transform_3, window_bounds = array<i64: 256, 128>}]} {
    %c0_i32 = arith.constant 0 : i32
    %0 = arith.cmpi eq, %arg2, %c0_i32 : i32
    %1 = arith.extui %0 : i1 to i32
    %c0_i32_0 = arith.constant 0 : i32
    %2 = arith.cmpi ne, %1, %c0_i32_0 : i32
    scf.if %2 {
      %cst_10 = arith.constant 0.000000e+00 : f32
      %12 = vector.broadcast %cst_10 : f32 to vector<256x128xf32>
      %c0_11 = arith.constant 0 : index
      %c0_12 = arith.constant 0 : index
      %13 = vector.load %arg7[%c0_11, %c0_12] : memref<256x128xf32, #tpu.memory_space<vmem>>, vector<256x128xf32>
      tpu.vector_store %arg7[%c0_11, %c0_12], %12 {strides = array<i32>} : memref<256x128xf32, #tpu.memory_space<vmem>>, vector<256x128xf32>,
    } else {
    }
    %c0 = arith.constant 0 : index
    %c0_1 = arith.constant 0 : index
    %3 = vector.load %arg7[%c0, %c0_1] : memref<256x128xf32, #tpu.memory_space<vmem>>, vector<256x128xf32>
    %c0_2 = arith.constant 0 : index
    %c0_3 = arith.constant 0 : index
    %4 = vector.load %arg3[%c0_2, %c0_3] : memref<256x256xbf16, #tpu.memory_space<vmem>>, vector<256x256xbf16>
    %c0_4 = arith.constant 0 : index
    %c0_5 = arith.constant 0 : index
    %5 = vector.load %arg4[%c0_4, %c0_5] : memref<256x128xbf16, #tpu.memory_space<vmem>>, vector<256x128xbf16>
    %cst = arith.constant dense<0.000000e+00> : vector<256x128xf32>
    %6 = tpu.matmul %4, %5, %cst {dimension_numbers = #tpu.dot_dimension_numbers<[1], [0], [0], [1], [0, 0, 1, 1], [], []>} : vector<256x256xbf16>, vector<256x128xbf16>, vector<256x128xf32> -> vector<256x128xf32>
    %7 = arith.addf %3, %6 : vector<256x128xf32>
    %c0_6 = arith.constant 0 : index
    %c0_7 = arith.constant 0 : index
    %8 = vector.load %arg7[%c0_6, %c0_7] : memref<256x128xf32, #tpu.memory_space<vmem>>, vector<256x128xf32>
    tpu.vector_store %arg7[%c0_6, %c0_7], %7 {strides = array<i32>} : memref<256x128xf32, #tpu.memory_space<vmem>>, vector<256x128xf32>,
    %c0_i32_8 = arith.constant 0 : i32
    %9 = arith.cmpi eq, %arg2, %c0_i32_8 : i32
    %10 = arith.extui %9 : i1 to i32
    %c0_i32_9 = arith.constant 0 : i32
    %11 = arith.cmpi ne, %10, %c0_i32_9 : i32
    scf.if %11 {
      %c0_10 = arith.constant 0 : index
      %c0_11 = arith.constant 0 : index
      %12 = vector.load %arg7[%c0_10, %c0_11] : memref<256x128xf32, #tpu.memory_space<vmem>>, vector<256x128xf32>
      %c0_12 = arith.constant 0 : index
      %c0_13 = arith.constant 0 : index
      %13 = vector.load %arg5[%c0_12, %c0_13] : memref<1x128xf32, #tpu.memory_space<vmem>>, vector<1x128xf32>
      %14 = vector.broadcast %13 : vector<1x128xf32> to vector<256x128xf32>
      %15 = arith.addf %12, %14 : vector<256x128xf32>
      %cst_14 = arith.constant 0.000000e+00 : f32
      %16 = vector.broadcast %cst_14 : f32 to vector<256x128xf32>
      %17 = arith.maximumf %15, %16 : vector<256x128xf32>
      %18 = arith.truncf %17 : vector<256x128xf32> to vector<256x128xbf16>
      %c0_15 = arith.constant 0 : index
      %c0_16 = arith.constant 0 : index
      %19 = vector.load %arg6[%c0_15, %c0_16] : memref<256x128xbf16, #tpu.memory_space<vmem>>, vector<256x128xbf16>
      tpu.vector_store %arg6[%c0_15, %c0_16], %18 {strides = array<i32>} : memref<256x128xbf16, #tpu.memory_space<vmem>>, vector<256x128xbf16>,
    } else {
    }
    return
  }
  func.func @transform_0(%arg0: i32, %arg1: i32, %arg2: i32) -> (i32, i32) {
    %c0_i32 = arith.constant 0 : i32
    return %arg0, %arg2 : i32, i32
  }
  func.func @transform_1(%arg0: i32, %arg1: i32, %arg2: i32) -> (i32, i32) {
    %c0_i32 = arith.constant 0 : i32
    return %arg2, %arg1 : i32, i32
  }
  func.func @transform_2(%arg0: i32, %arg1: i32, %arg2: i32) -> (i32, i32) {
    %c0_i32 = arith.constant 0 : i32
    %c0_i32_0 = arith.constant 0 : i32
    return %c0_i32, %arg1 : i32, i32
  }
  func.func @transform_3(%arg0: i32, %arg1: i32, %arg2: i32) -> (i32, i32) {
    %c0_i32 = arith.constant 0 : i32
    return %arg0, %arg1 : i32, i32
  }
}

</mosaic_0001>

<bundles_post_ra>
// kernel: tpu_custom_call.1
= control target key start
LH: loop header
LB: loop body
LE: loop exit
PB: predicated region body
PF: predicated region fallthrough
CT: control target
= control target key end

     0   :  { %8 = vsyncpa [#allocation4], 0  ;;  %s2209_s0 = inlined_call_operand.hbm [shape: bf16[2048,256], index: 0, kind: input, shape index: {}]   ;;  %s2210_s1 = inlined_call_operand.hbm [shape: bf16[256,128], index: 1, kind: input, shape index: {}]   ;;  %s2211_s2 = inlined_call_operand.vmem [shape: f32[1,128], index: 2, kind: input, shape index: {}]   ;;  %s2212_s3 = inlined_call_operand.hbm [shape: bf16[2048,128], index: 3, kind: output, shape index: {}]  }
   0x1   :  { %10 = vsyncpa [#allocation4 + $0x1], 0 }
   0x2   :  { %11 = vsyncpa [#allocation7], 0 }
   0x3   :  { %12 = vsyncpa [#allocation5], 0 }
   0x4   :  { %14 = vsyncpa [#allocation5 + $0x1], 0  ;;  %s1939_s12 = smov 0   ;;  %s1941_s13 = smov 0  }
   0x5   :  { %s1943_s14 = smov 0   ;;  %s1945_s15 = smov 0  }
   0x6   :  { %s1947_s16 = smov 0   ;;  %s1949_s17 = smov 0  }
   0x7 LB: > { %s1269_s18 = sadd.s32 4294967295, %s1908_s17   ;;  %s1270_s19 = sadd.s32 4294967294, %s1908_s17   ;;  %s1908_s17 = sphi %s1949_s17, %s20_s17   ;;  %s1904_s16 = sphi %s1947_s16, %s2229_s16   ;;  %s1900_s15 = sphi %s1945_s15, %s2228_s15   ;;  %s1896_s14 = sphi %s1943_s14, %s2227_s14   ;;  %s1892_s13 = sphi %s1941_s13, %s2226_s13   ;;  %s1888_s12 = sphi %s1939_s12, %s2225_s12  }
   0x8   : > { %p61_p0 = scmp.ne.s32.totalorder %s1892_s13, %s1888_s12  ;;  %p1973_p1 = scmp.eq.s32.totalorder %s1269_s18, 0 }
   0x9   : > { %p1977_p2 = scmp.eq.s32.totalorder %s1269_s18, 7  ;;  %p147_p3 = scmp.eq.s32.totalorder %s1270_s19, 7 }
   0xa   : > { %p1983_p4 = por %p1973_p1, %p61_p0  ;;  %p1271_p5 = scmp.ge.s32.totalorder %s1908_s17, 1 }
   0xb   : > { %p1988_p6 = por %p147_p3, %p61_p0  ;;  %p154_p7 = scmp.lt.s32.totalorder %s1908_s17, 9 }
   0xc   : > { %s1910_s25 = smov [#allocation6]   ;;  %s39_s28 = sadd.s32 1, %s1904_s16 }
   0xd   : > { %s2217_s23 = scalar_select %p1988_p6, 1, 0 }
   0xe   : > { %p1993_p8 = pnand %p1271_p5, %p154_p7  ;;  %s170_s26 = sshll.u32 %s1910_s25, 4  ;;  %s171_s26 = int_to_ptr.vmem [resolvable:$true] %s170_s26 }
   0xf   : > { %s1781_s29 = scalar_lea.vmem %s171_s26, 2048  ;;  %p1789_p3 = scmp.lt.s32.totalorder %s171_s26, %s171_s26 }
  0x10   : > { %p1635_p9 = pneg %p1993_p8  ;;  %p1782_p12 = scmp.ne.s32.totalorder %s171_s26, %s1781_s29 }
  0x11   : > { %p1790_p5 = scmp.lt.s32.totalorder %s1781_s29, %s1781_s29 }
  0x12   : > { %p2001_p10 = pnand %p1635_p9, %p1973_p1 }
  0x13   : > { %p1791_p7 = por %p1790_p5, %p1789_p3 }
  0x14   : > { %p1772_p11 = pneg %p2001_p10 }
  0x16   : > { %p1784_p13 = pnand %p1782_p12, %p1772_p11 }
  0x18   : > { %p1785_p0 = pneg %p1784_p13 }
  0x1a   : > { %p1792_p6 = pnand %p1791_p7, %p1785_p0 }
  0x1c   : > { %1795 = shalt.err (!%p1792_p6)
}
  0x1d   : > { %s1911_s30 = smov 64   ;;  %s1912_s4 = smov 4  }
  0x1e   : > { %1638 = dma.hbm_to_vmem [thread:$0]  (!%p2001_p10), %s2210_s1, 2048, %s171_s26, [#allocation7], %s1911_s30, %s1911_s30, %s1912_s4  }
  0x1f   : > { %p41_p9 = scmp.ge.s32.totalorder %s39_s28, 8  ;;  %s48_s7 = sadd.s32 1, %s1896_s14 }
  0x20   : > { %p55_p6 = scmp.ne.s32.totalorder %s1896_s14, %s1892_s13  ;;  %p56_p11 = scmp.eq.s32.totalorder %s1908_s17, 0 }
  0x21   : > { %s2231_s28 = smov (%p41_p9, %s39_s28), 0  ;;  %p1648_p0 = scmp.lt.s32.totalorder %s1908_s17, 8 }
  0x22   : > { %p2019_p12 = por %p56_p11, %p55_p6  ;;  %p2025_p13 = por %p1977_p2, %p55_p6 }
  0x23   : > { %s43_s10 = ssub.s32 %s1904_s16, %s2231_s28  ;;  %s190_s11 = sand.u32 1, %s1896_s14  }
  0x24   : > { %s2221_s9 = scalar_select %p2025_p13, 1, 0 }
  0x25   : > { %p46_p10 = scmp.eq.s32.totalorder %s43_s10, 0  ;;  %s1275_s18 = sshll.u32 %s190_s11, 8 }
  0x26   : > { %s1370_s25 = sshll.u32 %s1904_s16, 12  ;;  %s194_s30 = scalar_lea.vmem [#allocation3], %s1275_s18 }
  0x27   : > { %s2034_s19 = scalar_select %p46_p10, %s1896_s14, %s48_s7  }
  0x28   : > { %s203_s29 = scalar_lea.hbm %s2209_s0, %s1370_s25  ;;  %s204_s4 = sshll.u32 %s194_s30, 4  ;;  %s205_s4 = int_to_ptr.vmem [resolvable:$true] %s204_s4 }
  0x29   : > { %p2042_p2 = pnand %p1648_p0, %p2019_p12  ;;  %s191_s5 = scalar_lea.sflag [#allocation4], %s190_s11 }
  0x2a   : > { %s1809_s6 = scalar_lea.vmem %s205_s4, 4096  ;;  %s1913_s7 = smov [#allocation3]  }
  0x2b   : > { %p1798_p3 = pneg %p2042_p2  ;;  %p1810_p5 = scmp.ne.s32.totalorder %s205_s4, %s1809_s6 }
  0x2c   : > { %s1814_s10 = sshll.u32 %s1913_s7, 4  ;;  %s1815_s10 = int_to_ptr.vmem [resolvable:$false] %s1814_s10 }
  0x2d   : > { %p1812_p7 = pnand %p1810_p5, %p1798_p3  ;;  %s1816_s25 = scalar_lea.vmem %s1815_s10, 8192 }
  0x2e   : > { %p1817_p6 = scmp.lt.s32.totalorder %s205_s4, %s1815_s10  ;;  %p1818_p11 = scmp.lt.s32.totalorder %s1816_s25, %s1809_s6 }
  0x2f   : > { %p1813_p9 = pneg %p1812_p7 }
  0x30   : > { %p1819_p10 = por %p1818_p11, %p1817_p6 }
  0x32   : > { %p1820_p13 = pnand %p1819_p10, %p1813_p9 }
  0x34   : > { %1823 = shalt.err (!%p1820_p13)
}
  0x35   : > { %s1914_s8 = smov 128   ;;  %s1915_s18 = smov 8  }
  0x36   : > { %1642 = dma.hbm_to_vmem [thread:$0]  (!%p2042_p2), %s203_s29, 4096, %s205_s4, %s191_s5, %s1914_s8, %s1914_s8, %s1915_s18  }
  0x37   : > { %216 = sbr.rel (%p1993_p8) target bundleno = 373 (0x175), region = 32  ;;  %s2053_s11 = sand.u32 (!%p1993_p8), 1, %s1892_s13  }
  0x38   : > { %s1280_s26 = sshll.u32 (!%p1993_p8), %s2053_s11, 8  ;;  %s219_s27 = scalar_lea.sflag (!%p1993_p8), [#allocation4], %s2053_s11 }
  0x39   : > { %s2057_s30 = scalar_lea.vmem (!%p1993_p8), [#allocation3], %s1280_s26 }
  0x3c   : > { %1875 = dma.done.wait (%p1983_p4), %s219_s27, 4096  }
  0x3d   : > { %1877 = vsyncadd (%p1983_p4), %s219_s27, 4294963200 }
  0x3e   : > { %1879 = dma.done.wait (%p1973_p1), [#allocation7], 2048  }
  0x3f   : > { %1881 = vsyncadd (%p1973_p1), [#allocation7], 4294965248  ;;  %v1706_v0 = vld [vmem:[#allocation6 + $0x78] sm:$0xff]   ;;  %v1708_v2 = vld [vmem:[#allocation6 + $0x70] sm:$0xff]   ;;  %s1282_s24 = sshll.u32 %s2053_s11, 7  ;;  %s1403_s4 = sshll.u32 %s1900_s15, 11 }
  0x40   : > { %v1707_v1 = vld [vmem:[#allocation6 + $0x38] sm:$0xff]   ;;  %1499 = vmatprep.subr.bf16.mxu0 %v1706_v0  ;;  %1611 = vmatprep.subr.bf16.mxu1 %v1706_v0  ;;  %v1709_v3 = vld [vmem:[#allocation6 + $0x30] sm:$0xff]   ;;  %v1710_v4 = vld [vmem:[#allocation6 + $0x68] sm:$0xff]   ;;  %s2111_s29 = scalar_lea.vmem [#allocation8], %s1282_s24  ;;  %s2158_s7 = scalar_lea.hbm %s2212_s3, %s1403_s4 }
  0x41   : > { %1500 = vmatpush3.bf16.msra.mxu0 %v1707_v1  ;;  %1619 = vmatpush3.bf16.msra.mxu1 %v1707_v1  ;;  %v1711_v5 = vld [vmem:[#allocation6 + $0x28] sm:$0xff]   ;;  %v1712_v6 = vld [vmem:[#allocation6 + $0x60] sm:$0xff]   ;;  %v1714_v8 = vld [vmem:[#allocation6 + $0x58] sm:$0xff]   ;;  %s1154_s21 = sshll.u32 %s2111_s29, 4  ;;  %s1140_s15 = scalar_lea.sflag [#allocation5], %s2053_s11  ;;  %s2160_s21 = int_to_ptr.vmem [resolvable:$true] %s1154_s21 }
  0x42   : > { %1501 = vmatprep.subr.bf16.mxu0 %v1708_v2  ;;  %1612 = vmatprep.subr.bf16.mxu1 %v1708_v2  ;;  %v1713_v7 = vld [vmem:[#allocation6 + $0x20] sm:$0xff]   ;;  %v1715_v9 = vld [vmem:[#allocation6 + $0x18] sm:$0xff]   ;;  %v1716_v10 = vld [vmem:[#allocation6 + $0x50] sm:$0xff]   ;;  %s1824_s10 = scalar_lea.vmem %s2160_s21, 2048  ;;  %p2223_p4 = scmp.ne.s32.totalorder %s2221_s9, 0 }
  0x43   : > { %v1724_v11 = vld [vmem:[%s2057_s30 + $0x4] ss:$8 sps:$4 sm:$0xff]   ;;  %v1717_v13 = vld [vmem:[#allocation6 + $0x10] sm:$0xff]   ;;  %v1722_v18 = vld [vmem:[%s2057_s30] ss:$8 sps:$4 sm:$0xff]   ;;  %p1825_p1 = scmp.ne.s32.totalorder %s2160_s21, %s1824_s10  ;;  %s1916_s25 = smov [#allocation8]  }
  0x44   : > { %v1727_v12 = vld [vmem:[%s2057_s30 + $0x84] ss:$8 sps:$4 sm:$0xff]   ;;  %680 = vmatprep.mubr.bf16.mxu0 %v1724_v11  ;;  %v1725_v19 = vld [vmem:[%s2057_s30 + $0x80] ss:$8 sps:$4 sm:$0xff]   ;;  %v1728_v20 = vld [vmem:[%s2057_s30 + $0x14] ss:$8 sps:$4 sm:$0xff]  }
  0x45   : > { %1502 = vmatpush3.bf16.msra.mxu0 %v1709_v3  ;;  %1620 = vmatpush3.bf16.msra.mxu1 %v1709_v3  ;;  %v1718_v14 = vld [vmem:[#allocation6 + $0x48] sm:$0xff]   ;;  %v1720_v16 = vld [vmem:[#allocation6 + $0x40] sm:$0xff]   ;;  %v1730_v21 = vld [vmem:[%s2057_s30 + $0x94] ss:$8 sps:$4 sm:$0xff]   ;;  %p1826_p8 = pnand %p1825_p1, %p2223_p4  ;;  %s1828_s8 = sshll.u32 %s1916_s25, 4  ;;  %s1829_s8 = int_to_ptr.vmem [resolvable:$false] %s1828_s8 }
  0x46   : > { %1503 = vmatprep.subr.bf16.mxu0 %v1710_v4  ;;  %1613 = vmatprep.subr.bf16.mxu1 %v1710_v4  ;;  %v1719_v15 = vld [vmem:[#allocation6 + $0x8] sm:$0xff]   ;;  %v1721_v17 = vld [vmem:[#allocation6] sm:$0xff]   ;;  %v1732_v22 = vld [vmem:[%s2057_s30 + $0x10] ss:$8 sps:$4 sm:$0xff]   ;;  %s1830_s18 = scalar_lea.vmem %s1829_s8, 4096  ;;  %p1831_p13 = scmp.lt.s32.totalorder %s2160_s21, %s1829_s8 }
  0x47   : > { %744 = vmatprep.mubr.bf16.mxu1 %v1727_v12  ;;  %v1733_v23 = vld [vmem:[%s2057_s30 + $0x90] ss:$8 sps:$4 sm:$0xff]   ;;  %v1734_v24 = vld [vmem:[%s2057_s30 + $0x24] ss:$8 sps:$4 sm:$0xff]   ;;  %v1738_v26 = vld [vmem:[%s2057_s30 + $0x20] ss:$8 sps:$4 sm:$0xff]   ;;  %p1827_p12 = pneg %p1826_p8  ;;  %p1832_p0 = scmp.lt.s32.totalorder %s1830_s18, %s1824_s10 }
  0x48   : > { %v1736_v25 = vld [vmem:[%s2057_s30 + $0xa4] ss:$8 sps:$4 sm:$0xff]   ;;  %v1739_v27 = vld [vmem:[%s2057_s30 + $0xa0] ss:$8 sps:$4 sm:$0xff]   ;;  %v1740_v28 = vld [vmem:[%s2057_s30 + $0x34] ss:$8 sps:$4 sm:$0xff]  }
  0x49   : > { %1504 = vmatpush3.bf16.msra.mxu0 %v1711_v5  ;;  %1621 = vmatpush3.bf16.msra.mxu1 %v1711_v5  ;;  %v1742_v29 = vld [vmem:[%s2057_s30 + $0xb4] ss:$8 sps:$4 sm:$0xff]   ;;  %v1744_v30 = vld [vmem:[%s2057_s30 + $0x30] ss:$8 sps:$4 sm:$0xff]   ;;  %v1746_v32 = vld [vmem:[%s2057_s30 + $0x44] ss:$8 sps:$4 sm:$0xff]   ;;  %p1833_p2 = por %p1832_p0, %p1831_p13 }
  0x4a   : > { %1505 = vmatprep.subr.bf16.mxu0 %v1712_v6  ;;  %1614 = vmatprep.subr.bf16.mxu1 %v1712_v6  ;;  %v1745_v31 = vld [vmem:[%s2057_s30 + $0xb0] ss:$8 sps:$4 sm:$0xff]   ;;  %v1748_v33 = vld [vmem:[%s2057_s30 + $0xc4] ss:$8 sps:$4 sm:$0xff]   ;;  %v1750_v34 = vld [vmem:[%s2057_s30 + $0x40] ss:$8 sps:$4 sm:$0xff]  }
  0x4b   : > { %v1751_v35 = vld [vmem:[%s2057_s30 + $0xc0] ss:$8 sps:$4 sm:$0xff]   ;;  %v1752_v36 = vld [vmem:[%s2057_s30 + $0x54] ss:$8 sps:$4 sm:$0xff]   ;;  %v1756_v38 = vld [vmem:[%s2057_s30 + $0x50] ss:$8 sps:$4 sm:$0xff]   ;;  %p1834_p3 = pnand %p1833_p2, %p1827_p12 }
  0x4c   : > { %v1754_v37 = vld [vmem:[%s2057_s30 + $0xd4] ss:$8 sps:$4 sm:$0xff]   ;;  %v1757_v39 = vld [vmem:[%s2057_s30 + $0xd0] ss:$8 sps:$4 sm:$0xff]   ;;  %v1758_v40 = vld [vmem:[%s2057_s30 + $0x64] ss:$8 sps:$4 sm:$0xff]  }
  0x4d   : > { %1506 = vmatpush3.bf16.msra.mxu0 %v1713_v7  ;;  %1622 = vmatpush3.bf16.msra.mxu1 %v1713_v7  ;;  %v1760_v41 = vld [vmem:[%s2057_s30 + $0xe4] ss:$8 sps:$4 sm:$0xff]   ;;  %v1762_v42 = vld [vmem:[%s2057_s30 + $0x60] ss:$8 sps:$4 sm:$0xff]   ;;  %v1764_v44 = vld [vmem:[%s2057_s30 + $0x74] ss:$8 sps:$4 sm:$0xff]  }
  0x4e   : > { %1507 = vmatprep.subr.bf16.mxu0 %v1714_v8  ;;  %1615 = vmatprep.subr.bf16.mxu1 %v1714_v8  ;;  %v1763_v43 = vld [vmem:[%s2057_s30 + $0xe0] ss:$8 sps:$4 sm:$0xff]   ;;  %v1766_v45 = vld [vmem:[%s2057_s30 + $0xf4] ss:$8 sps:$4 sm:$0xff]   ;;  %v1768_v46 = vld [vmem:[%s2057_s30 + $0x70] ss:$8 sps:$4 sm:$0xff]  }
  0x4f   : > { %v1769_v47 = vld [vmem:[%s2057_s30 + $0xf0] ss:$8 sps:$4 sm:$0xff]   ;;  %v2102_v53 = vld [vmem:[%s2211_s2] ss:$0 sm:$0xff] }
  0x51   : > { %1508 = vmatpush3.bf16.msra.mxu0 %v1715_v9  ;;  %1623 = vmatpush3.bf16.msra.mxu1 %v1715_v9 }
  0x52   : > { %1509 = vmatprep.subr.bf16.mxu0 %v1716_v10  ;;  %1616 = vmatprep.subr.bf16.mxu1 %v1716_v10 }
  0x55   : > { %1510 = vmatpush3.bf16.msra.mxu0 %v1717_v13  ;;  %1624 = vmatpush3.bf16.msra.mxu1 %v1717_v13 }
  0x56   : > { %1511 = vmatprep.subr.bf16.mxu0 %v1718_v14  ;;  %1617 = vmatprep.subr.bf16.mxu1 %v1718_v14 }
  0x59   : > { %1512 = vmatpush3.bf16.msra.mxu0 %v1719_v15  ;;  %1625 = vmatpush3.bf16.msra.mxu1 %v1719_v15 }
  0x5a   : > { %1513 = vmatprep.subr.bf16.mxu0 %v1720_v16  ;;  %1618 = vmatprep.subr.bf16.mxu1 %v1720_v16 }
  0x5d   : > { %1514 = vmatpush3.bf16.msra.mxu0 %v1721_v17  ;;  %1626 = vmatpush3.bf16.msra.mxu1 %v1721_v17 }
  0x60   : > { %681 = vmatmul.mubr.bf16.vlgmr.msra.gmra.mxu0 %v1722_v18  ;;  %745 = vmatmul.mubr.bf16.vlgmr.msra.gmra.mxu1 %v1725_v19 }
  0x61   : > { %688 = vmatprep.mubr.bf16.mxu0 %v1728_v20  ;;  %752 = vmatprep.mubr.bf16.mxu1 %v1730_v21 }
  0x68   : > { %689 = vmatmul.mubr.bf16.gmra.mxu0 %v1732_v22  ;;  %753 = vmatmul.mubr.bf16.gmra.mxu1 %v1733_v23 }
  0x69   : > { %696 = vmatprep.mubr.bf16.mxu0 %v1734_v24  ;;  %760 = vmatprep.mubr.bf16.mxu1 %v1736_v25 }
  0x70   : > { %697 = vmatmul.mubr.bf16.gmra.mxu0 %v1738_v26  ;;  %761 = vmatmul.mubr.bf16.gmra.mxu1 %v1739_v27 }
  0x71   : > { %704 = vmatprep.mubr.bf16.mxu0 %v1740_v28  ;;  %768 = vmatprep.mubr.bf16.mxu1 %v1742_v29 }
  0x78   : > { %705 = vmatmul.mubr.bf16.gmra.mxu0 %v1744_v30  ;;  %769 = vmatmul.mubr.bf16.gmra.mxu1 %v1745_v31 }
  0x79   : > { %712 = vmatprep.mubr.bf16.mxu0 %v1746_v32  ;;  %776 = vmatprep.mubr.bf16.mxu1 %v1748_v33 }
  0x80   : > { %713 = vmatmul.mubr.bf16.gmra.mxu0 %v1750_v34  ;;  %777 = vmatmul.mubr.bf16.gmra.mxu1 %v1751_v35 }
  0x81   : > { %720 = vmatprep.mubr.bf16.mxu0 %v1752_v36  ;;  %784 = vmatprep.mubr.bf16.mxu1 %v1754_v37 }
  0x88   : > { %721 = vmatmul.mubr.bf16.gmra.mxu0 %v1756_v38  ;;  %785 = vmatmul.mubr.bf16.gmra.mxu1 %v1757_v39 }
  0x89   : > { %728 = vmatprep.mubr.bf16.mxu0 %v1758_v40  ;;  %792 = vmatprep.mubr.bf16.mxu1 %v1760_v41 }
  0x90   : > { %729 = vmatmul.mubr.bf16.gmra.mxu0 %v1762_v42  ;;  %793 = vmatmul.mubr.bf16.gmra.mxu1 %v1763_v43 }
  0x91   : > { %736 = vmatprep.mubr.bf16.mxu0 %v1764_v44  ;;  %800 = vmatprep.mubr.bf16.mxu1 %v1766_v45 }
  0x98   : > { %737 = vmatmul.mubr.bf16.gmra.mxu0 %v1768_v46  ;;  %801 = vmatmul.mubr.bf16.gmra.mxu1 %v1769_v47 }
 0x120   : > { %v1515_v48 = vpop.f32.mrf.mxu0  ;;  %v1563_v49 = vpop.f32.mrf.mxu1 }
 0x122   : > { %v1516_v50 = vpop.f32.mrf.mxu0  ;;  %v1564_v51 = vpop.f32.mrf.mxu1 }
 0x123   : > { %v1517_v52 = vadd.f32 %v1516_v50, %v1515_v48  ;;  %v1565_v54 = vadd.f32 %v1564_v51, %v1563_v49 }
 0x124   : > { %v1518_v55 = vpop.f32.mrf.mxu0  ;;  %v1566_v56 = vpop.f32.mrf.mxu1 }
 0x125   : > { %v915_v57 = vadd.f32 %v1517_v52, %v2102_v53  ;;  %v931_v58 = vadd.f32 %v1565_v54, %v2102_v53 }
 0x126   : > { %v1519_v59 = vpop.f32.mrf.mxu0  ;;  %v1567_v60 = vpop.f32.mrf.mxu1 }
 0x127   : > { %v1520_v61 = vadd.f32 %v1519_v59, %v1518_v55  ;;  %v1568_v62 = vadd.f32 %v1567_v60, %v1566_v56  ;;  %v947_v3 = vmax.f32 %v915_v57, 0.0  ;;  %v963_v4 = vmax.f32 %v931_v58, 0.0 }
 0x128   : > { %v1521_v63 = vpop.f32.mrf.mxu0  ;;  %v1569_v0 = vpop.f32.mrf.mxu1 }
 0x129   : > { %v916_v1 = vadd.f32 %v1520_v61, %v2102_v53  ;;  %v932_v2 = vadd.f32 %v1568_v62, %v2102_v53 }
 0x12a   : > { %v1522_v5 = vpop.f32.mrf.mxu0  ;;  %v1570_v6 = vpop.f32.mrf.mxu1 }
 0x12b   : > { %v948_v7 = vmax.f32 %v916_v1, 0.0  ;;  %v964_v8 = vmax.f32 %v932_v2, 0.0  ;;  %v1523_v9 = vadd.f32 %v1522_v5, %v1521_v63  ;;  %v1571_v10 = vadd.f32 %v1570_v6, %v1569_v0 }
 0x12c   : > { %v1524_v11 = vpop.f32.mrf.mxu0  ;;  %v1572_v12 = vpop.f32.mrf.mxu1 }
 0x12d   : > { %v1407_v13 = vpack.c.bf16 %v948_v7, %v947_v3  ;;  %v1447_v14 = vpack.c.bf16 %v964_v8, %v963_v4  ;;  %v917_v15 = vadd.f32 %v1523_v9, %v2102_v53  ;;  %v933_v16 = vadd.f32 %v1571_v10, %v2102_v53 }
 0x12e   : > { %v1525_v17 = vpop.f32.mrf.mxu0  ;;  %v1573_v18 = vpop.f32.mrf.mxu1 }
 0x12f   : > { %1408 = vst [vmem:[%s2111_s29] sm:$0xff] %v1407_v13   ;;  %1491 = vst [vmem:[%s2111_s29 + $0x40] sm:$0xff] %v1447_v14   ;;  %v1526_v19 = vadd.f32 %v1525_v17, %v1524_v11  ;;  %v1574_v20 = vadd.f32 %v1573_v18, %v1572_v12  ;;  %v949_v25 = vmax.f32 %v917_v15, 0.0  ;;  %v965_v26 = vmax.f32 %v933_v16, 0.0 }
 0x130   : > { %v1527_v21 = vpop.f32.mrf.mxu0  ;;  %v1575_v22 = vpop.f32.mrf.mxu1 }
 0x131   : > { %v918_v23 = vadd.f32 %v1526_v19, %v2102_v53  ;;  %v934_v24 = vadd.f32 %v1574_v20, %v2102_v53 }
 0x132   : > { %v1528_v27 = vpop.f32.mrf.mxu0  ;;  %v1576_v28 = vpop.f32.mrf.mxu1 }
 0x133   : > { %v950_v29 = vmax.f32 %v918_v23, 0.0  ;;  %v966_v30 = vmax.f32 %v934_v24, 0.0  ;;  %v1529_v31 = vadd.f32 %v1528_v27, %v1527_v21  ;;  %v1577_v32 = vadd.f32 %v1576_v28, %v1575_v22 }
 0x134   : > { %v1530_v33 = vpop.f32.mrf.mxu0  ;;  %v1578_v34 = vpop.f32.mrf.mxu1 }
 0x135   : > { %v1412_v35 = vpack.c.bf16 %v950_v29, %v949_v25  ;;  %v1452_v36 = vpack.c.bf16 %v966_v30, %v965_v26  ;;  %v919_v37 = vadd.f32 %v1529_v31, %v2102_v53  ;;  %v935_v38 = vadd.f32 %v1577_v32, %v2102_v53 }
 0x136   : > { %v1531_v39 = vpop.f32.mrf.mxu0  ;;  %v1579_v40 = vpop.f32.mrf.mxu1 }
 0x137   : > { %1484 = vst [vmem:[%s2111_s29 + $0x8] sm:$0xff] %v1412_v35   ;;  %1492 = vst [vmem:[%s2111_s29 + $0x48] sm:$0xff] %v1452_v36   ;;  %v1532_v41 = vadd.f32 %v1531_v39, %v1530_v33  ;;  %v1580_v42 = vadd.f32 %v1579_v40, %v1578_v34  ;;  %v951_v47 = vmax.f32 %v919_v37, 0.0  ;;  %v967_v48 = vmax.f32 %v935_v38, 0.0 }
 0x138   : > { %v1533_v43 = vpop.f32.mrf.mxu0  ;;  %v1581_v44 = vpop.f32.mrf.mxu1 }
 0x139   : > { %v920_v45 = vadd.f32 %v1532_v41, %v2102_v53  ;;  %v936_v46 = vadd.f32 %v1580_v42, %v2102_v53 }
 0x13a   : > { %v1534_v49 = vpop.f32.mrf.mxu0  ;;  %v1582_v50 = vpop.f32.mrf.mxu1 }
 0x13b   : > { %v952_v51 = vmax.f32 %v920_v45, 0.0  ;;  %v968_v52 = vmax.f32 %v936_v46, 0.0  ;;  %v1535_v54 = vadd.f32 %v1534_v49, %v1533_v43  ;;  %v1583_v55 = vadd.f32 %v1582_v50, %v1581_v44 }
 0x13c   : > { %v1536_v56 = vpop.f32.mrf.mxu0  ;;  %v1584_v57 = vpop.f32.mrf.mxu1 }
 0x13d   : > { %v1417_v58 = vpack.c.bf16 %v952_v51, %v951_v47  ;;  %v1457_v59 = vpack.c.bf16 %v968_v52, %v967_v48  ;;  %v921_v60 = vadd.f32 %v1535_v54, %v2102_v53  ;;  %v937_v61 = vadd.f32 %v1583_v55, %v2102_v53 }
 0x13e   : > { %v1537_v62 = vpop.f32.mrf.mxu0  ;;  %v1585_v63 = vpop.f32.mrf.mxu1 }
 0x13f   : > { %1485 = vst [vmem:[%s2111_s29 + $0x10] sm:$0xff] %v1417_v58   ;;  %1493 = vst [vmem:[%s2111_s29 + $0x50] sm:$0xff] %v1457_v59   ;;  %v1538_v0 = vadd.f32 %v1537_v62, %v1536_v56  ;;  %v1586_v1 = vadd.f32 %v1585_v63, %v1584_v57  ;;  %v953_v6 = vmax.f32 %v921_v60, 0.0  ;;  %v969_v7 = vmax.f32 %v937_v61, 0.0 }
 0x140   : > { %v1539_v2 = vpop.f32.mrf.mxu0  ;;  %v1587_v3 = vpop.f32.mrf.mxu1 }
 0x141   : > { %v922_v4 = vadd.f32 %v1538_v0, %v2102_v53  ;;  %v938_v5 = vadd.f32 %v1586_v1, %v2102_v53 }
 0x142   : > { %v1540_v8 = vpop.f32.mrf.mxu0  ;;  %v1588_v9 = vpop.f32.mrf.mxu1 }
 0x143   : > { %v954_v10 = vmax.f32 %v922_v4, 0.0  ;;  %v970_v11 = vmax.f32 %v938_v5, 0.0  ;;  %v1541_v12 = vadd.f32 %v1540_v8, %v1539_v2  ;;  %v1589_v13 = vadd.f32 %v1588_v9, %v1587_v3 }
 0x144   : > { %v1542_v14 = vpop.f32.mrf.mxu0  ;;  %v1590_v15 = vpop.f32.mrf.mxu1 }
 0x145   : > { %v1422_v16 = vpack.c.bf16 %v954_v10, %v953_v6  ;;  %v1462_v17 = vpack.c.bf16 %v970_v11, %v969_v7  ;;  %v923_v18 = vadd.f32 %v1541_v12, %v2102_v53  ;;  %v939_v19 = vadd.f32 %v1589_v13, %v2102_v53 }
 0x146   : > { %v1543_v20 = vpop.f32.mrf.mxu0  ;;  %v1591_v21 = vpop.f32.mrf.mxu1 }
 0x147   : > { %1486 = vst [vmem:[%s2111_s29 + $0x18] sm:$0xff] %v1422_v16   ;;  %1494 = vst [vmem:[%s2111_s29 + $0x58] sm:$0xff] %v1462_v17   ;;  %v1544_v22 = vadd.f32 %v1543_v20, %v1542_v14  ;;  %v1592_v23 = vadd.f32 %v1591_v21, %v1590_v15  ;;  %v955_v28 = vmax.f32 %v923_v18, 0.0  ;;  %v971_v29 = vmax.f32 %v939_v19, 0.0 }
 0x148   : > { %v1545_v24 = vpop.f32.mrf.mxu0  ;;  %v1593_v25 = vpop.f32.mrf.mxu1 }
 0x149   : > { %v924_v26 = vadd.f32 %v1544_v22, %v2102_v53  ;;  %v940_v27 = vadd.f32 %v1592_v23, %v2102_v53 }
 0x14a   : > { %v1546_v30 = vpop.f32.mrf.mxu0  ;;  %v1594_v31 = vpop.f32.mrf.mxu1 }
 0x14b   : > { %v956_v32 = vmax.f32 %v924_v26, 0.0  ;;  %v972_v33 = vmax.f32 %v940_v27, 0.0  ;;  %v1547_v34 = vadd.f32 %v1546_v30, %v1545_v24  ;;  %v1595_v35 = vadd.f32 %v1594_v31, %v1593_v25 }
 0x14c   : > { %v1548_v36 = vpop.f32.mrf.mxu0  ;;  %v1596_v37 = vpop.f32.mrf.mxu1 }
 0x14d   : > { %v1427_v38 = vpack.c.bf16 %v956_v32, %v955_v28  ;;  %v1467_v39 = vpack.c.bf16 %v972_v33, %v971_v29  ;;  %v925_v40 = vadd.f32 %v1547_v34, %v2102_v53  ;;  %v941_v41 = vadd.f32 %v1595_v35, %v2102_v53 }
 0x14e   : > { %v1549_v42 = vpop.f32.mrf.mxu0  ;;  %v1597_v43 = vpop.f32.mrf.mxu1 }
 0x14f   : > { %1487 = vst [vmem:[%s2111_s29 + $0x20] sm:$0xff] %v1427_v38   ;;  %1495 = vst [vmem:[%s2111_s29 + $0x60] sm:$0xff] %v1467_v39   ;;  %v1550_v44 = vadd.f32 %v1549_v42, %v1548_v36  ;;  %v1598_v45 = vadd.f32 %v1597_v43, %v1596_v37  ;;  %v957_v50 = vmax.f32 %v925_v40, 0.0  ;;  %v973_v51 = vmax.f32 %v941_v41, 0.0 }
 0x150   : > { %v1551_v46 = vpop.f32.mrf.mxu0  ;;  %v1599_v47 = vpop.f32.mrf.mxu1 }
 0x151   : > { %v926_v48 = vadd.f32 %v1550_v44, %v2102_v53  ;;  %v942_v49 = vadd.f32 %v1598_v45, %v2102_v53 }
 0x152   : > { %v1552_v52 = vpop.f32.mrf.mxu0  ;;  %v1600_v54 = vpop.f32.mrf.mxu1 }
 0x153   : > { %v958_v55 = vmax.f32 %v926_v48, 0.0  ;;  %v974_v56 = vmax.f32 %v942_v49, 0.0  ;;  %v1553_v57 = vadd.f32 %v1552_v52, %v1551_v46  ;;  %v1601_v58 = vadd.f32 %v1600_v54, %v1599_v47 }
 0x154   : > { %v1554_v59 = vpop.f32.mrf.mxu0  ;;  %v1602_v60 = vpop.f32.mrf.mxu1 }
 0x155   : > { %v1432_v61 = vpack.c.bf16 %v958_v55, %v957_v50  ;;  %v1472_v62 = vpack.c.bf16 %v974_v56, %v973_v51  ;;  %v927_v63 = vadd.f32 %v1553_v57, %v2102_v53  ;;  %v943_v0 = vadd.f32 %v1601_v58, %v2102_v53 }
 0x156   : > { %v1555_v1 = vpop.f32.mrf.mxu0  ;;  %v1603_v2 = vpop.f32.mrf.mxu1 }
 0x157   : > { %1488 = vst [vmem:[%s2111_s29 + $0x28] sm:$0xff] %v1432_v61   ;;  %1496 = vst [vmem:[%s2111_s29 + $0x68] sm:$0xff] %v1472_v62   ;;  %v1556_v3 = vadd.f32 %v1555_v1, %v1554_v59  ;;  %v1604_v4 = vadd.f32 %v1603_v2, %v1602_v60  ;;  %v959_v9 = vmax.f32 %v927_v63, 0.0  ;;  %v975_v10 = vmax.f32 %v943_v0, 0.0 }
 0x158   : > { %v1557_v5 = vpop.f32.mrf.mxu0  ;;  %v1605_v6 = vpop.f32.mrf.mxu1 }
 0x159   : > { %v928_v7 = vadd.f32 %v1556_v3, %v2102_v53  ;;  %v944_v8 = vadd.f32 %v1604_v4, %v2102_v53 }
 0x15a   : > { %v1558_v11 = vpop.f32.mrf.mxu0  ;;  %v1606_v12 = vpop.f32.mrf.mxu1 }
 0x15b   : > { %v960_v13 = vmax.f32 %v928_v7, 0.0  ;;  %v976_v14 = vmax.f32 %v944_v8, 0.0  ;;  %v1559_v15 = vadd.f32 %v1558_v11, %v1557_v5  ;;  %v1607_v16 = vadd.f32 %v1606_v12, %v1605_v6 }
 0x15c   : > { %v1560_v17 = vpop.f32.mrf.mxu0  ;;  %v1608_v18 = vpop.f32.mrf.mxu1 }
 0x15d   : > { %v1437_v19 = vpack.c.bf16 %v960_v13, %v959_v9  ;;  %v1477_v20 = vpack.c.bf16 %v976_v14, %v975_v10  ;;  %v929_v23 = vadd.f32 %v1559_v15, %v2102_v53  ;;  %v945_v24 = vadd.f32 %v1607_v16, %v2102_v53 }
 0x15e   : > { %v1561_v21 = vpop.f32.mrf.mxu0  ;;  %v1609_v22 = vpop.f32.mrf.mxu1 }
 0x15f   : > { %1489 = vst [vmem:[%s2111_s29 + $0x30] sm:$0xff] %v1437_v19   ;;  %1497 = vst [vmem:[%s2111_s29 + $0x70] sm:$0xff] %v1477_v20   ;;  %v1562_v25 = vadd.f32 %v1561_v21, %v1560_v17  ;;  %v1610_v26 = vadd.f32 %v1609_v22, %v1608_v18  ;;  %v961_v29 = vmax.f32 %v929_v23, 0.0  ;;  %v977_v30 = vmax.f32 %v945_v24, 0.0 }
 0x161   : > { %v930_v27 = vadd.f32 %v1562_v25, %v2102_v53  ;;  %v946_v28 = vadd.f32 %v1610_v26, %v2102_v53 }
 0x163   : > { %v962_v31 = vmax.f32 %v930_v27, 0.0  ;;  %v978_v32 = vmax.f32 %v946_v28, 0.0 }
 0x165   : > { %v1442_v33 = vpack.c.bf16 %v962_v31, %v961_v29  ;;  %v1482_v34 = vpack.c.bf16 %v978_v32, %v977_v30 }
 0x167   : > { %1490 = vst [vmem:[%s2111_s29 + $0x38] sm:$0xff] %v1442_v33   ;;  %1498 = vst [vmem:[%s2111_s29 + $0x78] sm:$0xff] %v1482_v34  }
 0x168   : > { %1837 = shalt.err (!%p1834_p3)
}
 0x169   : > { %s1838_s26 = scalar_lea.hbm %s2158_s7, 2048  ;;  %s1842_s20 = scalar_lea.hbm %s2212_s3, 16384 }
 0x16a   : > { %p1839_p5 = scmp.ne.s32.totalorder %s2158_s7, %s1838_s26  ;;  %p1843_p6 = scmp.lt.s32.totalorder %s2158_s7, %s2212_s3 }
 0x16b   : > { %p1844_p11 = scmp.lt.s32.totalorder %s1842_s20, %s1838_s26 }
 0x16c   : > { %p1840_p7 = pnand %p1839_p5, %p2223_p4 }
 0x16d   : > { %p1845_p10 = por %p1844_p11, %p1843_p6 }
 0x16e   : > { %p1841_p9 = pneg %p1840_p7 }
 0x170   : > { %p1846_p1 = pnand %p1845_p10, %p1841_p9 }
 0x172   : > { %1849 = shalt.err (!%p1846_p1)
}
 0x173   : > { %s1917_s29 = smov 64   ;;  %s1918_s4 = smov 4  }
 0x174   : > { %1633 = dma.vmem_to_hbm [thread:$0]  (%p2223_p4), %s2160_s21, 2048, %s2158_s7, %s1140_s15, %s1917_s29, %s1917_s29, %s1918_s4  }
 0x175 PF: > { %p1650_p8 = scmp.ge.s32.totalorder %s1908_s17, 2  ;;  %s1169_s5 = sand.u32 1, %s1888_s12  }
 0x176   : > { %p2224_p12 = scmp.ne.s32.totalorder %s2217_s23, 0  ;;  %s1170_s6 = scalar_lea.sflag [#allocation5], %s1169_s5 }
 0x178   : > { %p1644_p13 = pnand %p1650_p8, %p2224_p12 }
 0x17a   : > { %p1645_p0 = pneg %p1644_p13 }
 0x17c   : > { %1883 = dma.done.wait (%p1645_p0), %s1170_s6, 2048  }
 0x17d   : > { %1885 = vsyncadd (%p1645_p0), %s1170_s6, 4294965248  ;;  %s20_s17 = sadd.s32 1, %s1908_s17   ;;  %s2225_s12 = smov %s1892_s13 }
 0x17e   : > { %p17_p2 = scmp.ge.s32.totalorder %s20_s17, 10   ;;  %s2226_s13 = smov %s1896_s14 }
 0x17f   : > { %s2227_s14 = smov %s2034_s19  ;;  %s2228_s15 = smov %s1904_s16 }
 0x180   : > { %s2229_s16 = smov %s2231_s28  ;;  %19 = sbr.rel (!%p17_p2) target bundleno = 7 (0x7), region = 93 }
 0x185   :  { %1175 = vsyncpa [#allocation4], 1 }
 0x186   :  { %1177 = vsyncpa [#allocation4 + $0x1], 1 }
 0x187   :  { %1178 = vsyncpa [#allocation7], 1 }
 0x188   :  { %1179 = vsyncpa [#allocation5], 1 }
 0x189   :  { %1181 = vsyncpa [#allocation5 + $0x1], 1 }

</bundles_post_ra>
